<compile_context>
chip_gen: v7x
topology: tpu7x:2x2x1
jax: 0.10.0
libtpu: 0.0.40
codegen_flags: <defaults>
</compile_context>

<pallas_src>
import functools
import math

import jax
import jax.numpy as jnp
from jax import lax
from jax.experimental import pallas as pl
from jax.experimental.pallas import tpu as pltpu

EPS = 1e-6
NEG_INF = -1e9

MATMUL_DTYPE = jnp.bfloat16     # MXU operand dtype (f32 accumulation kept)
ACT_DTYPE = jnp.bfloat16        # inter-kernel activation handoffs (qkv, q, kv)
_WB = 2 if MATMUL_DTYPE == jnp.bfloat16 else 4   # weight bytes (cost hints)
_AB = 2 if ACT_DTYPE == jnp.bfloat16 else 4      # activation bytes (cost hints)

_ROW_TILE_CAP = 256             # row tile for LN / projection / FFN kernels
_Q_TILE_CAP = 256               # query tile for the attention kernels
_VMEM_LIMIT = 48 * 1024 * 1024  # < v7x 64 MiB physical, > v5e/v6e defaults


def _row_tile(m):
    return m if m <= _ROW_TILE_CAP else _ROW_TILE_CAP


def _q_tile(t):
    return t if t <= _Q_TILE_CAP else _Q_TILE_CAP


def _cparams(n_parallel_axes):
    return pltpu.CompilerParams(
        dimension_semantics=("parallel",) * n_parallel_axes,
        vmem_limit_bytes=_VMEM_LIMIT)


def _const_spec(shape):
    # Grid-invariant block (weights / biases / LN gains): constant index map +
    # single buffering so no second VMEM buffer is allocated.
    return pl.BlockSpec(shape, lambda *_: (0,) * len(shape),
                        pipeline_mode=pl.Buffered(1))


# ------------------- shared in-kernel LayerNorm (unbiased std) ---------------
def _ln(x, a, b):
    d = x.shape[-1]
    mean = jnp.mean(x, axis=-1, keepdims=True)
    xc = x - mean
    var = jnp.sum(xc * xc, axis=-1, keepdims=True) / (d - 1)  # unbiased (torch .std())
    inv = pl.reciprocal(jnp.sqrt(var) + EPS)                  # exact; EUP slot
    return a * xc * inv + b


# ------------------- kernel bodies -------------------------------------------
def _layernorm_kernel(x_ref, a_ref, b_ref, o_ref):
    o_ref[...] = _ln(x_ref[...].astype(jnp.float32),
                     a_ref[...], b_ref[...]).astype(o_ref.dtype)


def _ln_matmul_kernel(x_ref, a_ref, b_ref, w_ref, bias_ref, o_ref):
    # LayerNorm(x) @ W + bias   (fused: x tile read once)
    xn = _ln(x_ref[...].astype(jnp.float32), a_ref[...], b_ref[...])
    acc = jnp.dot(xn.astype(MATMUL_DTYPE), w_ref[...].astype(MATMUL_DTYPE),
                  preferred_element_type=jnp.float32)
    o_ref[...] = (acc + bias_ref[...]).astype(o_ref.dtype)


def _matmul_kernel(x_ref, w_ref, bias_ref, o_ref):
    acc = jnp.dot(x_ref[...].astype(MATMUL_DTYPE), w_ref[...].astype(MATMUL_DTYPE),
                  preferred_element_type=jnp.float32)
    o_ref[...] = (acc + bias_ref[...]).astype(o_ref.dtype)


def _ln_ffn_kernel(x_ref, ga_ref, gb_ref, w1_ref, b1_ref, w2_ref, b2_ref, o_ref):
    # x + w2 @ relu(w1 @ LayerNorm(x) + b1) + b2   (fully fused)
    x = x_ref[...].astype(jnp.float32)
    xn = _ln(x, ga_ref[...], gb_ref[...])
    hmid = jnp.dot(xn.astype(MATMUL_DTYPE), w1_ref[...].astype(MATMUL_DTYPE),
                   preferred_element_type=jnp.float32)
    hmid = jnp.maximum(hmid + b1_ref[...], 0.0)
    y = jnp.dot(hmid.astype(MATMUL_DTYPE), w2_ref[...].astype(MATMUL_DTYPE),
                preferred_element_type=jnp.float32) + b2_ref[...]
    o_ref[...] = (y + x).astype(o_ref.dtype)


def _attn_core(q, k, v, bias, res, wo, bo, ctx_ref, h, out_dtype):
    # q: (tq, D) (1/sqrt(d_k) already folded into the Q weights); k/v: (Tk, D);
    # bias: (mq, Tk) additive (0 / -1e9), mq in {1, tq}.  Each head's context
    # goes straight into the VMEM ctx scratch, so only one (tq, Tk) score tile
    # is live at a time; out-projection + residual are fused at the end.
    D = q.shape[-1]
    dk = D // h
    for j in range(h):
        sl = slice(j * dk, (j + 1) * dk)
        s = lax.dot_general(q[:, sl].astype(MATMUL_DTYPE),
                            k[:, sl].astype(MATMUL_DTYPE),
                            (((1,), (1,)), ((), ())),
                            preferred_element_type=jnp.float32)        # (tq, Tk)
        s = s + bias
        s = s - jnp.max(s, axis=-1, keepdims=True)
        p = jnp.exp(s)
        p = p * pl.reciprocal(jnp.sum(p, axis=-1, keepdims=True), approx=True)
        ctx_ref[:, sl] = jnp.dot(p.astype(MATMUL_DTYPE),
                                 v[:, sl].astype(MATMUL_DTYPE),
                                 preferred_element_type=jnp.float32
                                 ).astype(ctx_ref.dtype)
    # Fused output projection + residual (ctx never leaves VMEM).
    y = jnp.dot(ctx_ref[...], wo.astype(MATMUL_DTYPE),
                preferred_element_type=jnp.float32)
    return (y + bo + res.astype(jnp.float32)).astype(out_dtype)


def _self_attn_kernel(q_ref, kv_ref, bias_ref, res_ref, wo_ref, bo_ref,
                      o_ref, ctx_ref, *, h, d_model):
    q = q_ref[0]
    if q.shape[-1] != d_model:          # packed (tq, 3D) view: take the Q third
        q = q[:, :d_model]
    kv = kv_ref[0]                      # (Tk, 3D) packed [Q|K|V], full sequence
    k = kv[:, d_model:2 * d_model]
    v = kv[:, 2 * d_model:]
    o_ref[0] = _attn_core(q, k, v, bias_ref[0], res_ref[0],
                          wo_ref[...], bo_ref[...], ctx_ref, h, o_ref.dtype)


def _cross_attn_kernel(q_ref, kv_ref, bias_ref, res_ref, wo_ref, bo_ref,
                       o_ref, ctx_ref, *, h, d_model):
    kv = kv_ref[0]                      # (Tk, 2D) packed [K|V]
    o_ref[0] = _attn_core(q_ref[0], kv[:, :d_model], kv[:, d_model:],
                          bias_ref[0], res_ref[0],
                          wo_ref[...], bo_ref[...], ctx_ref, h, o_ref.dtype)


# ------------------- pallas_call wrappers -------------------------------------
def layernorm(x2d, a, b):
    M, D = x2d.shape
    tm = _row_tile(M)
    return pl.pallas_call(
        _layernorm_kernel,
        grid=(pl.cdiv(M, tm),),
        in_specs=[pl.BlockSpec((tm, D), lambda i: (i, 0)),
                  _const_spec((1, D)), _const_spec((1, D))],
        out_specs=pl.BlockSpec((tm, D), lambda i: (i, 0)),
        out_shape=jax.ShapeDtypeStruct((M, D), x2d.dtype),
        compiler_params=_cparams(1),
    )(x2d, a.reshape(1, -1), b.reshape(1, -1))


def ln_matmul(x2d, a, b, w, bias, out_dtype):
    M, D = x2d.shape
    N = w.shape[1]
    tm = _row_tile(M)
    return pl.pallas_call(
        _ln_matmul_kernel,
        grid=(pl.cdiv(M, tm),),
        in_specs=[pl.BlockSpec((tm, D), lambda i: (i, 0)),
                  _const_spec((1, D)), _const_spec((1, D)),
                  _const_spec((D, N)), _const_spec((1, N))],
        out_specs=pl.BlockSpec((tm, N), lambda i: (i, 0)),
        out_shape=jax.ShapeDtypeStruct((M, N), out_dtype),
        compiler_params=_cparams(1),
        cost_estimate=pl.CostEstimate(
            flops=2 * M * D * N + 8 * M * D, transcendentals=2 * M,
            bytes_accessed=M * D * 4 + D * N * _WB + M * N * _AB + 4 * (N + 2 * D)),
    )(x2d, a.reshape(1, -1), b.reshape(1, -1), w, bias.reshape(1, -1))


def matmul(x2d, w, bias, out_dtype):
    M, K = x2d.shape
    N = w.shape[1]
    tm = _row_tile(M)
    return pl.pallas_call(
        _matmul_kernel,
        grid=(pl.cdiv(M, tm),),
        in_specs=[pl.BlockSpec((tm, K), lambda i: (i, 0)),
                  _const_spec((K, N)), _const_spec((1, N))],
        out_specs=pl.BlockSpec((tm, N), lambda i: (i, 0)),
        out_shape=jax.ShapeDtypeStruct((M, N), out_dtype),
        compiler_params=_cparams(1),
        cost_estimate=pl.CostEstimate(
            flops=2 * M * K * N, transcendentals=0,
            bytes_accessed=M * K * 4 + K * N * _WB + M * N * _AB + 4 * N),
    )(x2d, w, bias.reshape(1, -1))


def ln_ffn_residual(x2d, ga, gb, w1, b1, w2, b2):
    M, D = x2d.shape
    F = w1.shape[1]
    tm = _row_tile(M)
    return pl.pallas_call(
        _ln_ffn_kernel,
        grid=(pl.cdiv(M, tm),),
        in_specs=[pl.BlockSpec((tm, D), lambda i: (i, 0)),
                  _const_spec((1, D)), _const_spec((1, D)),
                  _const_spec((D, F)), _const_spec((1, F)),
                  _const_spec((F, D)), _const_spec((1, D))],
        out_specs=pl.BlockSpec((tm, D), lambda i: (i, 0)),
        out_shape=jax.ShapeDtypeStruct((M, D), x2d.dtype),
        compiler_params=_cparams(1),
        cost_estimate=pl.CostEstimate(
            flops=4 * M * D * F + 10 * M * D, transcendentals=2 * M,
            bytes_accessed=2 * M * D * 4 + 2 * D * F * _WB + 4 * (F + 3 * D)),
    )(x2d, ga.reshape(1, -1), gb.reshape(1, -1),
      w1, b1.reshape(1, -1), w2, b2.reshape(1, -1))


def _bias_spec(Bm, Mq, Tk, tq):
    mq_blk = 1 if Mq == 1 else tq

    def ix(b, qi):
        return (0 if Bm == 1 else b, 0 if Mq == 1 else qi, 0)

    return pl.BlockSpec((1, mq_blk, Tk), ix)


def self_attention(qkv, bias, res, wo, bo, h, d_model):
    # qkv: (B, Tq, 3D) packed; bias: (Bm, Mq, Tq) additive; res: (B, Tq, D) f32.
    B, Tq, threeD = qkv.shape
    Bm, Mq, Tk = bias.shape
    assert Tk == Tq and Mq in (1, Tq) and Bm in (1, B)
    tq = _q_tile(Tq)
    nq = pl.cdiv(Tq, tq)
    # When d_model is lane-aligned, DMA only the Q third for the query tile.
    q_blk_last = d_model if d_model % 128 == 0 else threeD
    return pl.pallas_call(
        functools.partial(_self_attn_kernel, h=h, d_model=d_model),
        grid=(B, nq),
        in_specs=[pl.BlockSpec((1, tq, q_blk_last), lambda b, qi: (b, qi, 0)),
                  pl.BlockSpec((1, Tq, threeD), lambda b, qi: (b, 0, 0)),
                  _bias_spec(Bm, Mq, Tk, tq),
                  pl.BlockSpec((1, tq, d_model), lambda b, qi: (b, qi, 0)),
                  _const_spec((d_model, d_model)), _const_spec((1, d_model))],
        out_specs=pl.BlockSpec((1, tq, d_model), lambda b, qi: (b, qi, 0)),
        out_shape=jax.ShapeDtypeStruct((B, Tq, d_model), res.dtype),
        scratch_shapes=[pltpu.VMEM((tq, d_model), MATMUL_DTYPE)],
        compiler_params=_cparams(2),
        cost_estimate=pl.CostEstimate(
            flops=4 * B * Tq * Tk * d_model + 2 * B * Tq * d_model * d_model,
            transcendentals=B * Tq * Tk,
            bytes_accessed=(B * Tq * q_blk_last * _AB + nq * B * Tq * threeD * _AB
                            + Bm * Mq * Tk * 4 + 2 * B * Tq * d_model * 4
                            + d_model * d_model * _WB)),
    )(qkv, qkv, bias, res, wo, bo.reshape(1, -1))


def cross_attention(q, kv, bias, res, wo, bo, h, d_model):
    # q: (B, Tq, D); kv: (B, Tk, 2D) packed; bias: (Bm, Mq, Tk); res: (B, Tq, D).
    B, Tq, D = q.shape
    _, Tk, twoD = kv.shape
    Bm, Mq, _ = bias.shape
    assert Mq in (1, Tq) and Bm in (1, B)
    tq = _q_tile(Tq)
    nq = pl.cdiv(Tq, tq)
    return pl.pallas_call(
        functools.partial(_cross_attn_kernel, h=h, d_model=d_model),
        grid=(B, nq),
        in_specs=[pl.BlockSpec((1, tq, D), lambda b, qi: (b, qi, 0)),
                  pl.BlockSpec((1, Tk, twoD), lambda b, qi: (b, 0, 0)),
                  _bias_spec(Bm, Mq, Tk, tq),
                  pl.BlockSpec((1, tq, d_model), lambda b, qi: (b, qi, 0)),
                  _const_spec((d_model, d_model)), _const_spec((1, d_model))],
        out_specs=pl.BlockSpec((1, tq, d_model), lambda b, qi: (b, qi, 0)),
        out_shape=jax.ShapeDtypeStruct((B, Tq, d_model), res.dtype),
        scratch_shapes=[pltpu.VMEM((tq, d_model), MATMUL_DTYPE)],
        compiler_params=_cparams(2),
        cost_estimate=pl.CostEstimate(
            flops=4 * B * Tq * Tk * d_model + 2 * B * Tq * d_model * d_model,
            transcendentals=B * Tq * Tk,
            bytes_accessed=(B * Tq * D * _AB + nq * B * Tk * twoD * _AB
                            + Bm * Mq * Tk * 4 + 2 * B * Tq * d_model * 4
                            + d_model * d_model * _WB)),
    )(q, kv, bias, res, wo, bo.reshape(1, -1))


# ------------------- Decoder layer + Decoder stack ---------------------------
def decoder_layer(lp, x, memory, src_bias, tgt_bias, h):
    B, T, D = x.shape
    Ts = memory.shape[1]
    x2 = x.reshape(B * T, D)
    m2 = memory.reshape(B * Ts, D)

    # sublayer 0: pre-norm self-attention + fused out-proj + residual
    sa = lp["self_attn"]
    qkv = ln_matmul(x2, lp["ln0_a"], lp["ln0_b"], sa["wqkv"], sa["bqkv"], ACT_DTYPE)
    x2 = self_attention(qkv.reshape(B, T, 3 * D), tgt_bias,
                        x2.reshape(B, T, D), sa["wo"], sa["bo"],
                        h, D).reshape(B * T, D)

    # sublayer 1: pre-norm source attention + fused out-proj + residual
    ca = lp["src_attn"]
    q = ln_matmul(x2, lp["ln1_a"], lp["ln1_b"], ca["wq"], ca["bq"], ACT_DTYPE)
    kv = matmul(m2, ca["wkv"], ca["bkv"], ACT_DTYPE)
    x2 = cross_attention(q.reshape(B, T, D), kv.reshape(B, Ts, 2 * D), src_bias,
                         x2.reshape(B, T, D), ca["wo"], ca["bo"],
                         h, D).reshape(B * T, D)

    # sublayer 2: pre-norm position-wise FFN + residual (fully fused)
    x2 = ln_ffn_residual(x2, lp["ln2_a"], lp["ln2_b"],
                         lp["w1"], lp["b1"], lp["w2"], lp["b2"])
    return x2.reshape(B, T, D)


def decoder_forward(params, x, memory, src_mask, tgt_mask, h):
    B, T, D = x.shape
    # Convert 0/1 masks ONCE to additive -1e9 biases (no per-head HBM broadcast).
    src_bias = jnp.where(src_mask == 0, NEG_INF, 0.0).astype(jnp.float32)
    tgt_bias = jnp.where(tgt_mask == 0, NEG_INF, 0.0).astype(jnp.float32)
    for lp in params["layers"]:
        x = decoder_layer(lp, x, memory, src_bias, tgt_bias, h)
    return layernorm(x.reshape(B * T, D), params["norm_a"],
                     params["norm_b"]).reshape(B, T, D)


# ------------------- Parameter init + packing --------------------------------
def init_params(key, d_model, d_ff, h, n_layers):
    def lin(k, din, dout):
        kw, kb = jax.random.split(k)
        return (jax.random.normal(kw, (din, dout), jnp.float32) * 0.05,
                jax.random.normal(kb, (dout,), jnp.float32) * 0.05)

    def attn_params(k):
        ks = jax.random.split(k, 4)
        wq, bq = lin(ks[0], d_model, d_model)
        wk, bk = lin(ks[1], d_model, d_model)
        wv, bv = lin(ks[2], d_model, d_model)
        wo, bo = lin(ks[3], d_model, d_model)
        return dict(wq=wq, bq=bq, wk=wk, bk=bk, wv=wv, bv=bv, wo=wo, bo=bo)

    keys = jax.random.split(key, n_layers)
    layers = []
    for lk in keys:
        ks = jax.random.split(lk, 4)
        w1, b1 = lin(ks[2], d_model, d_ff)
        w2, b2 = lin(ks[3], d_ff, d_model)
        layers.append(dict(
            self_attn=attn_params(ks[0]), src_attn=attn_params(ks[1]),
            w1=w1, b1=b1, w2=w2, b2=b2,
            ln0_a=jnp.ones((d_model,), jnp.float32),
            ln0_b=jnp.zeros((d_model,), jnp.float32),
            ln1_a=jnp.ones((d_model,), jnp.float32),
            ln1_b=jnp.zeros((d_model,), jnp.float32),
            ln2_a=jnp.ones((d_model,), jnp.float32),
            ln2_b=jnp.zeros((d_model,), jnp.float32)))
    return dict(layers=layers,
                norm_a=jnp.ones((d_model,), jnp.float32),
                norm_b=jnp.zeros((d_model,), jnp.float32))


def pack_params(raw, h):
    """One-time host-side packing: fused QKV / KV weights, 1/sqrt(d_k) folded
    into the Q projection, matmul weights pre-cast to the MXU dtype (bf16)."""
    d_model = raw["norm_a"].shape[0]
    scale = 1.0 / math.sqrt(d_model // h)
    wdt = MATMUL_DTYPE

    def pack_attn(ap):
        return dict(
            wqkv=jnp.concatenate([ap["wq"] * scale, ap["wk"], ap["wv"]],
                                 axis=1).astype(wdt),
            bqkv=jnp.concatenate([ap["bq"] * scale, ap["bk"], ap["bv"]], axis=0),
            wq=(ap["wq"] * scale).astype(wdt), bq=ap["bq"] * scale,
            wkv=jnp.concatenate([ap["wk"], ap["wv"]], axis=1).astype(wdt),
            bkv=jnp.concatenate([ap["bk"], ap["bv"]], axis=0),
            wo=ap["wo"].astype(wdt), bo=ap["bo"])

    layers = []
    for lp in raw["layers"]:
        layers.append(dict(
            self_attn=pack_attn(lp["self_attn"]),
            src_attn=pack_attn(lp["src_attn"]),
            w1=lp["w1"].astype(wdt), b1=lp["b1"],
            w2=lp["w2"].astype(wdt), b2=lp["b2"],
            ln0_a=lp["ln0_a"], ln0_b=lp["ln0_b"],
            ln1_a=lp["ln1_a"], ln1_b=lp["ln1_b"],
            ln2_a=lp["ln2_a"], ln2_b=lp["ln2_b"]))
    return dict(layers=layers, norm_a=raw["norm_a"], norm_b=raw["norm_b"])


if __name__ == "__main__":
    B, T_tgt, T_src = 2, 8, 10
    d_model, d_ff, h, n_layers = 32, 64, 4, 2

    key = jax.random.PRNGKey(0)
    k1, k2, k3 = jax.random.split(key, 3)
    x = jax.random.normal(k1, (B, T_tgt, d_model), jnp.float32)
    memory = jax.random.normal(k2, (B, T_src, d_model), jnp.float32)
    src_mask = jnp.ones((1, 1, T_src), jnp.float32)        # like Variable(torch.ones(1,1,10))
    tgt_mask = jnp.tril(jnp.ones((T_tgt, T_tgt), jnp.float32))[None, :, :]

    params = pack_params(init_params(k3, d_model, d_ff, h, n_layers), h)

    out = decoder_forward(params, x, memory, src_mask, tgt_mask, h)
    jax.block_until_ready(out)
    assert out.shape == (B, T_tgt, d_model)
    assert bool(jnp.all(jnp.isfinite(out)))
    print("KERNEL_OK")
</pallas_src>

<mosaic_0001>
module attributes {stable_mosaic.version = 11 : i64} {
  func.func @_ln_matmul_kernel(%arg0: i32, %arg1: memref<16x32xf32, #tpu.memory_space<vmem>>, %arg2: memref<1x32xf32, #tpu.memory_space<vmem>>, %arg3: memref<1x32xf32, #tpu.memory_space<vmem>>, %arg4: memref<32x96xbf16, #tpu.memory_space<vmem>>, %arg5: memref<1x96xf32, #tpu.memory_space<vmem>>, %arg6: memref<16x96xbf16, #tpu.memory_space<vmem>>) attributes {dimension_semantics = [#tpu.dimension_semantics<parallel>], iteration_bounds = array<i64: 1>, scalar_prefetch = 0 : i64, scratch_operands = 0 : i64, tpu.core_type = #tpu.core_type<tc>, window_params = [{transform_indices = @transform_0, window_bounds = array<i64: 16, 32>}, {pipeline_mode = #tpu.pipeline_mode<synchronous>, transform_indices = @transform_1, window_bounds = array<i64: 1, 32>}, {pipeline_mode = #tpu.pipeline_mode<synchronous>, transform_indices = @transform_2, window_bounds = array<i64: 1, 32>}, {pipeline_mode = #tpu.pipeline_mode<synchronous>, transform_indices = @transform_3, window_bounds = array<i64: 32, 96>}, {pipeline_mode = #tpu.pipeline_mode<synchronous>, transform_indices = @transform_4, window_bounds = array<i64: 1, 96>}, {transform_indices = @transform_5, window_bounds = array<i64: 16, 96>}]} {
    %c0 = arith.constant 0 : index
    %c0_0 = arith.constant 0 : index
    %0 = vector.load %arg1[%c0, %c0_0] : memref<16x32xf32, #tpu.memory_space<vmem>>, vector<16x32xf32>
    %c0_1 = arith.constant 0 : index
    %c0_2 = arith.constant 0 : index
    %1 = vector.load %arg2[%c0_1, %c0_2] : memref<1x32xf32, #tpu.memory_space<vmem>>, vector<1x32xf32>
    %c0_3 = arith.constant 0 : index
    %c0_4 = arith.constant 0 : index
    %2 = vector.load %arg3[%c0_3, %c0_4] : memref<1x32xf32, #tpu.memory_space<vmem>>, vector<1x32xf32>
    %cst = arith.constant dense<0.000000e+00> : vector<16xf32>
    %3 = vector.multi_reduction <add>, %0, %cst [1] : vector<16x32xf32> to vector<16xf32>
    %4 = vector.shape_cast %3 : vector<16xf32> to vector<16x1xf32>
    %cst_5 = arith.constant 3.200000e+01 : f32
    %5 = vector.broadcast %cst_5 : f32 to vector<16x1xf32>
    %6 = arith.divf %4, %5 : vector<16x1xf32>
    %7 = vector.broadcast %6 : vector<16x1xf32> to vector<16x32xf32>
    %8 = arith.subf %0, %7 : vector<16x32xf32>
    %9 = arith.mulf %8, %8 : vector<16x32xf32>
    %cst_6 = arith.constant dense<0.000000e+00> : vector<16xf32>
    %10 = vector.multi_reduction <add>, %9, %cst_6 [1] : vector<16x32xf32> to vector<16xf32>
    %11 = vector.shape_cast %10 : vector<16xf32> to vector<16x1xf32>
    %cst_7 = arith.constant 3.100000e+01 : f32
    %12 = vector.broadcast %cst_7 : f32 to vector<16x1xf32>
    %13 = arith.divf %11, %12 : vector<16x1xf32>
    %14 = math.sqrt %13 : vector<16x1xf32>
    %cst_8 = arith.constant 9.99999997E-7 : f32
    %15 = vector.broadcast %cst_8 : f32 to vector<16x1xf32>
    %16 = arith.addf %14, %15 : vector<16x1xf32>
    %17 = tpu.reciprocal %16 : vector<16x1xf32> -> vector<16x1xf32>
    %18 = vector.broadcast %1 : vector<1x32xf32> to vector<16x32xf32>
    %19 = arith.mulf %18, %8 : vector<16x32xf32>
    %20 = vector.broadcast %17 : vector<16x1xf32> to vector<16x32xf32>
    %21 = arith.mulf %19, %20 : vector<16x32xf32>
    %22 = vector.broadcast %2 : vector<1x32xf32> to vector<16x32xf32>
    %23 = arith.addf %21, %22 : vector<16x32xf32>
    %24 = arith.truncf %23 : vector<16x32xf32> to vector<16x32xbf16>
    %c0_9 = arith.constant 0 : index
    %c0_10 = arith.constant 0 : index
    %25 = vector.load %arg4[%c0_9, %c0_10] : memref<32x96xbf16, #tpu.memory_space<vmem>>, vector<32x96xbf16>
    %cst_11 = arith.constant dense<0.000000e+00> : vector<16x96xf32>
    %26 = tpu.matmul %24, %25, %cst_11 {dimension_numbers = #tpu.dot_dimension_numbers<[1], [0], [0], [1], [0, 0, 1, 1], [], []>} : vector<16x32xbf16>, vector<32x96xbf16>, vector<16x96xf32> -> vector<16x96xf32>
    %c0_12 = arith.constant 0 : index
    %c0_13 = arith.constant 0 : index
    %27 = vector.load %arg5[%c0_12, %c0_13] : memref<1x96xf32, #tpu.memory_space<vmem>>, vector<1x96xf32>
    %28 = vector.broadcast %27 : vector<1x96xf32> to vector<16x96xf32>
    %29 = arith.addf %26, %28 : vector<16x96xf32>
    %30 = arith.truncf %29 : vector<16x96xf32> to vector<16x96xbf16>
    %c0_14 = arith.constant 0 : index
    %c0_15 = arith.constant 0 : index
    %31 = vector.load %arg6[%c0_14, %c0_15] : memref<16x96xbf16, #tpu.memory_space<vmem>>, vector<16x96xbf16>
    tpu.vector_store %arg6[%c0_14, %c0_15], %30 {strides = array<i32>} : memref<16x96xbf16, #tpu.memory_space<vmem>>, vector<16x96xbf16>,
    return
  }
  func.func @transform_0(%arg0: i32) -> (i32, i32) {
    %c0_i32 = arith.constant 0 : i32
    %c0_i32_0 = arith.constant 0 : i32
    return %arg0, %c0_i32 : i32, i32
  }
  func.func @transform_1(%arg0: i32) -> (i32, i32) {
    %c0_i32 = arith.constant 0 : i32
    %c0_i32_0 = arith.constant 0 : i32
    %c0_i32_1 = arith.constant 0 : i32
    return %c0_i32, %c0_i32_0 : i32, i32
  }
  func.func @transform_2(%arg0: i32) -> (i32, i32) {
    %c0_i32 = arith.constant 0 : i32
    %c0_i32_0 = arith.constant 0 : i32
    %c0_i32_1 = arith.constant 0 : i32
    return %c0_i32, %c0_i32_0 : i32, i32
  }
  func.func @transform_3(%arg0: i32) -> (i32, i32) {
    %c0_i32 = arith.constant 0 : i32
    %c0_i32_0 = arith.constant 0 : i32
    %c0_i32_1 = arith.constant 0 : i32
    return %c0_i32, %c0_i32_0 : i32, i32
  }
  func.func @transform_4(%arg0: i32) -> (i32, i32) {
    %c0_i32 = arith.constant 0 : i32
    %c0_i32_0 = arith.constant 0 : i32
    %c0_i32_1 = arith.constant 0 : i32
    return %c0_i32, %c0_i32_0 : i32, i32
  }
  func.func @transform_5(%arg0: i32) -> (i32, i32) {
    %c0_i32 = arith.constant 0 : i32
    %c0_i32_0 = arith.constant 0 : i32
    return %arg0, %c0_i32 : i32, i32
  }
}

</mosaic_0001>

<bundles_post_ra>
// kernel: tpu_custom_call.1
= control target key start
LH: loop header
LB: loop body
LE: loop exit
PB: predicated region body
PF: predicated region fallthrough
CT: control target
= control target key end

     0   :  { %10 = vsyncpa [#allocation3], 0  ;;  %s417_s0 = inlined_call_operand.hbm [shape: f32[16,32], index: 0, kind: input, shape index: {}]   ;;  %s418_s1 = inlined_call_operand.vmem [shape: f32[1,32], index: 1, kind: input, shape index: {}]   ;;  %s419_s2 = inlined_call_operand.vmem [shape: f32[1,32], index: 2, kind: input, shape index: {}]   ;;  %s420_s3 = inlined_call_operand.hbm [shape: bf16[32,96], index: 3, kind: input, shape index: {}]   ;;  %s421_s4 = inlined_call_operand.vmem [shape: f32[1,96], index: 4, kind: input, shape index: {}]   ;;  %s422_s5 = inlined_call_operand.hbm [shape: bf16[16,96], index: 5, kind: output, shape index: {}]  }
   0x1   :  { %11 = vsyncpa [#allocation6], 0 }
   0x2   :  { %12 = vsyncpa [#allocation4], 0  ;;  %s322_s18 = smov [#allocation2]   ;;  %s250_s22 = scalar_lea.hbm %s417_s0, 256 }
   0x3   :  { %s18_s19 = sshll.u32 %s322_s18, 4  ;;  %p251_p0 = scmp.ne.s32.totalorder %s417_s0, %s250_s22  ;;  %s19_s19 = int_to_ptr.vmem [resolvable:$true] %s18_s19 }
   0x4   :  { %p254_p1 = scmp.lt.u32.totalorder %s250_s22, %s417_s0 }
   0x6   :  { %p256_p2 = pnand %p254_p1, %p251_p0 }
   0x8   :  { %259 = shalt.err (!%p256_p2)
}
   0x9   :  { %s260_s27 = scalar_lea.vmem %s19_s19, 256  ;;  %p265_p4 = scmp.lt.s32.totalorder %s19_s19, %s19_s19 }
   0xa   :  { %p261_p3 = scmp.ne.s32.totalorder %s19_s19, %s260_s27  ;;  %p266_p5 = scmp.lt.s32.totalorder %s260_s27, %s260_s27 }
   0xc   :  { %p267_p6 = por %p266_p5, %p265_p4 }
   0xe   :  { %p268_p7 = pnand %p267_p6, %p261_p3 }
  0x10   :  { %271 = shalt.err (!%p268_p7)
}
  0x11   :  { %s323_s28 = smov 128   ;;  %s324_s29 = smov 8  }
  0x12   :  { %24 = dma.hbm_to_vmem [thread:$0]  %s417_s0, 256, %s19_s19, [#allocation3], %s323_s28, %s323_s28, %s324_s29  }
  0x13   :  { %s325_s7 = smov [#allocation5]   ;;  %s272_s11 = scalar_lea.hbm %s420_s3, 256 }
  0x14   :  { %s34_s8 = sshll.u32 %s325_s7, 4  ;;  %p273_p8 = scmp.ne.s32.totalorder %s420_s3, %s272_s11  ;;  %s35_s8 = int_to_ptr.vmem [resolvable:$true] %s34_s8 }
  0x15   :  { %p276_p9 = scmp.lt.u32.totalorder %s272_s11, %s420_s3 }
  0x17   :  { %p278_p10 = pnand %p276_p9, %p273_p8 }
  0x19   :  { %281 = shalt.err (!%p278_p10)
}
  0x1a   :  { %s282_s16 = scalar_lea.vmem %s35_s8, 256  ;;  %p287_p12 = scmp.lt.s32.totalorder %s35_s8, %s35_s8 }
  0x1b   :  { %p283_p11 = scmp.ne.s32.totalorder %s35_s8, %s282_s16  ;;  %p288_p13 = scmp.lt.s32.totalorder %s282_s16, %s282_s16 }
  0x1d   :  { %p289_p0 = por %p288_p13, %p287_p12 }
  0x1f   :  { %p290_p1 = pnand %p289_p0, %p283_p11 }
  0x21   :  { %293 = shalt.err (!%p290_p1)
}
  0x22   :  { %s326_s0 = smov 64   ;;  %s327_s17 = smov 4  }
  0x23   :  { %40 = dma.hbm_to_vmem [thread:$0]  %s420_s3, 256, %s35_s8, [#allocation6], %s326_s0, %s326_s0, %s327_s17  }
  0x24   :  { %316 = dma.done.wait [#allocation3], 256  }
  0x25   :  { %317 = vsyncadd [#allocation3], 4294967040 }
  0x26   :  { %318 = dma.done.wait [#allocation6], 256  }
  0x27   :  { %319 = vsyncadd [#allocation6], 4294967040  ;;  %vm54_vm0 = vcmask 261120   ;;  %v50_v0 = vld [vmem:[#allocation2] sm:$0xff]  ;;  %v51_v1 = vld [vmem:[#allocation2 + $0x8] sm:$0xff]  ;;  %v328_v15 = vmov 0.0  }
  0x28   :  { %v55_v2 = vsel %vm54_vm0, %v50_v0, 0.0  ;;  %v58_v3 = vsel %vm54_vm0, %v51_v1, 0.0  ;;  %v240_v14 = vld [vmem:[#allocation5] sm:$0xff]   ;;  %223 = vmatprep.subr.bf16.mxu0 %v328_v15  ;;  %vm329_vm1 = vmmov 0   ;;  %v241_v16 = vld [vmem:[#allocation5 + $0x8] sm:$0xff]   ;;  %vm189_vm6 = vcmask 781312  }
  0x29   :  { %56 = vadd.xlane.f32.xlu0 %v55_v2  ;;  %227 = vmatprep.mubr.msk.bf16.mxu0 %vm329_vm1, %v328_v15  ;;  %v210_v33 = vld [vmem:[%s418_s1] ss:$0 sm:$0xff]  ;;  %s330_s1 = smov [#allocation7]  }
  0x2a   :  { %224 = vmatpush3.bf16.msra.mxu0 %v240_v14  ;;  %v211_v39 = vld [vmem:[%s419_s2] ss:$0 sm:$0xff]  ;;  %s197_s25 = sshll.u32 %s330_s1, 4  ;;  %s198_s25 = int_to_ptr.vmem [resolvable:$true] %s197_s25 }
  0x2b   :  { %225 = vmatprep.subr.bf16.mxu0 %v328_v15  ;;  %v212_v44 = vld [vmem:[%s421_s4] ss:$0 sm:$0xff]  ;;  %s294_s2 = scalar_lea.vmem %s198_s25, 128  ;;  %p299_p3 = scmp.lt.s32.totalorder %s198_s25, %s198_s25 }
  0x2c   :  { %p295_p2 = scmp.ne.s32.totalorder %s198_s25, %s294_s2  ;;  %p300_p4 = scmp.lt.s32.totalorder %s294_s2, %s294_s2 }
  0x2d   :  { %59 = vadd.xlane.f32.xlu0 %v58_v3 }
  0x2e   :  { %226 = vmatpush3.bf16.msra.mxu0 %v241_v16  ;;  %p301_p5 = por %p300_p4, %p299_p3 }
  0x30   :  { %p302_p6 = pnand %p301_p5, %p295_p2 }
  0xb6   :  { %v57_v4 = vpop.xlane.xlu0 %56 }
  0xb7   :  { %v62_v5 = vmul.f32 0.03125, %v57_v4 }
  0xb9   :  { %v64_v6 = vsub.f32 %v50_v0, %v62_v5 }
  0xba   :  { %v60_v7 = vpop.xlane.xlu0 %59 }
  0xbb   :  { %v63_v8 = vmul.f32 0.03125, %v60_v7  ;;  %v66_v9 = vmul.f32 %v64_v6, %v64_v6  ;;  %v101_v35 = vmul.f32 %v210_v33, %v64_v6 }
  0xbd   :  { %v65_v10 = vsub.f32 %v51_v1, %v63_v8  ;;  %v68_v11 = vsel %vm54_vm0, %v66_v9, 0.0 }
  0xbe   :  { %69 = vadd.xlane.f32.xlu1 %v68_v11 }
  0xbf   :  { %v67_v12 = vmul.f32 %v65_v10, %v65_v10  ;;  %v102_v36 = vmul.f32 %v210_v33, %v65_v10 }
  0xc1   :  { %v71_v13 = vsel %vm54_vm0, %v67_v12, 0.0 }
  0xc2   :  { %72 = vadd.xlane.f32.xlu1 %v71_v13 }
 0x14b   :  { %v70_v17 = vpop.xlane.xlu1 %69 }
 0x14c   :  { %v75_v18 = vmul.f32 0.032258064, %v70_v17 }
 0x14e   :  { %242 = vrsqrt.f32 %v75_v18  ;;  %vm79_vm2 = vcmp.eq.f32.partialorder %v75_v18, inf  ;;  %v82_v23 = vand.u32 2147483648, %v75_v18  ;;  %vm81_vm3 = vcmp.eq.f32.partialorder %v75_v18, 0.0 }
 0x14f   :  { %v73_v19 = vpop.xlane.xlu1 %72 }
 0x150   :  { %v76_v20 = vmul.f32 0.032258064, %v73_v19 }
 0x152   :  { %244 = vrsqrt.f32 %v76_v20  ;;  %vm86_vm4 = vcmp.eq.f32.partialorder %v76_v20, inf  ;;  %v89_v29 = vand.u32 2147483648, %v76_v20  ;;  %vm88_vm5 = vcmp.eq.f32.partialorder %v76_v20, 0.0 }
 0x158   :  { %v243_v21 = vpop.eup %242 }
 0x159   :  { %v78_v22 = vmul.f32 %v243_v21, %v75_v18 }
 0x15b   :  { %v80_v24 = vsel %vm79_vm2, %v75_v18, %v78_v22 }
 0x15c   :  { %v245_v25 = vpop.eup %244  ;;  %v83_v26 = vsel %vm81_vm3, %v82_v23, %v80_v24 }
 0x15d   :  { %v91_v27 = vadd.f32 1e-06, %v83_v26  ;;  %v85_v28 = vmul.f32 %v245_v25, %v76_v20 }
 0x15f   :  { %246 = vrcp.f32 %v91_v27  ;;  %v87_v30 = vsel %vm86_vm4, %v76_v20, %v85_v28 }
 0x160   :  { %v90_v31 = vsel %vm88_vm5, %v89_v29, %v87_v30 }
 0x161   :  { %v92_v32 = vadd.f32 1e-06, %v90_v31 }
 0x163   :  { %248 = vrcp.f32 %v92_v32 }
 0x169   :  { %v247_v34 = vpop.eup %246 }
 0x16a   :  { %v103_v37 = vmul.f32 %v247_v34, %v101_v35 }
 0x16c   :  { %v111_v41 = vadd.f32 %v211_v39, %v103_v37 }
 0x16d   :  { %v249_v38 = vpop.eup %248 }
 0x16e   :  { %v104_v40 = vmul.f32 %v249_v38, %v102_v36 }
 0x170   :  { %v112_v42 = vadd.f32 %v211_v39, %v104_v40 }
 0x172   :  { %v113_v43 = vpack.c.bf16 %v112_v42, %v111_v41 }
 0x174   :  { %228 = vmatmul.mubr.msk.bf16.vlgmr.msra.gmra.mrb[0].mxu0 %vm54_vm0, %v113_v43 }
 0x247   :  { %v174_v45 = vpop.f32.mrb[0].mxu0 }
 0x248   :  { %v175_v46 = vadd.f32 %v212_v44, %v174_v45  ;;  %v229_v47 = vpop.f32.mrb[1].mxu0 }
 0x249   :  { %v177_v48 = vpop.f32.mrb[2].mxu0 }
 0x24a   :  { %v218_v49 = vpack.c.bf16 %v175_v46, %v175_v46  ;;  %v178_v50 = vadd.f32 %v212_v44, %v177_v48  ;;  %v230_v51 = vpop.f32.mrb[3].mxu0 }
 0x24c   :  { %v219_v52 = vpack.c.bf16 %v178_v50, %v178_v50  ;;  %190 = vst.msk [vmem:[#allocation7] sm:$0xf] %vm189_vm6, %v218_v49 }
 0x24e   :  { %191 = vst.msk [vmem:[#allocation7 + $0x4] sm:$0xf] %vm189_vm6, %v219_v52 }
 0x24f   :  { %305 = shalt.err (!%p302_p6)
}
 0x250   :  { %s306_s27 = scalar_lea.hbm %s422_s5, 128 }
 0x251   :  { %p307_p7 = scmp.ne.s32.totalorder %s422_s5, %s306_s27  ;;  %p310_p8 = scmp.lt.u32.totalorder %s306_s27, %s422_s5 }
 0x253   :  { %p312_p9 = pnand %p310_p8, %p307_p7 }
 0x255   :  { %315 = shalt.err (!%p312_p9)
}
 0x256   :  { %203 = dma.vmem_to_hbm [thread:$0]  %s198_s25, 128, %s422_s5, [#allocation4], %s326_s0, %s326_s0, %s327_s17  }
 0x257   :  { %320 = dma.done.wait [#allocation4], 128  }
 0x258   :  { %321 = vsyncadd [#allocation4], 4294967168 }
 0x259   :  { %207 = vsyncpa [#allocation3], 1 }
 0x25a   :  { %208 = vsyncpa [#allocation6], 1 }
 0x25b   :  { %209 = vsyncpa [#allocation4], 1 }

</bundles_post_ra>
